<compile_context>
chip_gen: v5e
topology: v5e:2x2
jax: 0.10.0
libtpu: 0.0.40
codegen_flags: <defaults>
</compile_context>

<pallas_src>
import math

import jax
import jax.numpy as jnp
from jax import lax
from jax.experimental import pallas as pl
from jax.experimental.pallas import tpu as pltpu

_MAX_BLOCK_BYTES = 2 * 1024 * 1024    # ~2 MiB/block -> <=8 MiB live (in+out, double-buffered)
_VMEM_LIMIT_BYTES = 32 * 1024 * 1024  # explicit scoped-VMEM limit, safe on v5e/v6e/v7x


def _sublane_step(itemsize: int) -> int:
    """Native sublane tile: 8 rows for 4-byte, 16 for 2-byte, 32 for 1-byte dtypes."""
    return max(8, 32 // max(1, itemsize))


def _pick_divisor(n: int, step: int, max_val: int) -> int:
    """Largest divisor of n that is a multiple of `step` (or n itself, which is always
    layout-legal as a full dim) and <= max_val; if nothing fits the budget, the
    smallest aligned divisor (minimizes VMEM)."""
    cand = [d for d in range(1, n + 1) if n % d == 0 and (d % step == 0 or d == n)]
    fit = [d for d in cand if d <= max_val]
    return max(fit) if fit else min(cand)


# --------------------------------------------------------------------------- kernels

_FLIP_SUPPORT = {}


def _in_kernel_flip_supported(kind: str) -> bool:
    """One-time probe: does jnp.flip lower inside a Pallas TPU kernel for this axis kind?"""
    if kind not in _FLIP_SUPPORT:
        ax = 0 if kind == "sublane" else 1

        def probe_kernel(x_ref, o_ref):
            o_ref[...] = jnp.flip(x_ref[...], axis=ax)

        try:
            x = jnp.arange(8 * 256, dtype=jnp.float32).reshape(8, 256)
            y = pl.pallas_call(
                probe_kernel,
                out_shape=jax.ShapeDtypeStruct((8, 256), jnp.float32),
            )(x)
            _FLIP_SUPPORT[kind] = bool(
                jnp.array_equal(jax.block_until_ready(y), jnp.flip(x, axis=ax)))
        except Exception:
            _FLIP_SUPPORT[kind] = False
    return _FLIP_SUPPORT[kind]


def _make_flip_kernel(ndim: int, flip_axis: int, t_blk: int, vectorized: bool):
    if vectorized:
        def kernel(x_ref, o_ref):
            # Whole-tile reverse: full-vreg XLU shuffles + unmasked full-width stores,
            # so the kernel stays HBM-DMA bound.
            o_ref[...] = jnp.flip(x_ref[...], axis=flip_axis)
        return kernel

    # Compatibility fallback (only if jnp.flip does not lower on this backend):
    # per-row copies in a short statically-unrolled loop; t_blk is capped at the
    # native sublane group (or 128 lanes) in this mode, so the unroll stays small.
    def _sl(i):
        return tuple(pl.ds(i, 1) if a == flip_axis else slice(None) for a in range(ndim))

    def kernel(x_ref, o_ref):
        if t_blk == 1:
            o_ref[...] = x_ref[...]
        elif t_blk <= 32:
            for r in range(t_blk):
                o_ref[_sl(r)] = x_ref[_sl(t_blk - 1 - r)]
        else:
            def body(r, carry):
                o_ref[_sl(r)] = x_ref[_sl(t_blk - 1 - r)]
                return carry
            lax.fori_loop(0, t_blk, body, 0)
    return kernel


# ------------------------------------------------------------------- pallas wrappers

def _flip_pallas_3d(x3: jnp.ndarray, vectorized: bool) -> jnp.ndarray:
    """Flip axis 1 (the sublane-adjacent axis) of a 3-D (B, T, C) array in one pass."""
    Bl, T, Ct = x3.shape
    isz = jnp.dtype(x3.dtype).itemsize
    s = _sublane_step(isz)

    # Trailing (lane) block: full C if even 8 sublane rows of it fit the budget.
    if 8 * Ct * isz <= _MAX_BLOCK_BYTES:
        c_blk = Ct
    else:
        c_blk = _pick_divisor(Ct, 128, max(1, _MAX_BLOCK_BYTES // (8 * isz)))
    # Flipped-axis block: largest aligned divisor under the byte budget.
    max_t = max(1, _MAX_BLOCK_BYTES // (c_blk * isz)) if vectorized else s
    t_blk = _pick_divisor(T, s, max_t)
    # Leading (batch) block: bound block bytes independent of B.
    max_b = max(1, _MAX_BLOCK_BYTES // (t_blk * c_blk * isz))
    b_blk = _pick_divisor(Bl, 1, max_b)

    nT, nC = T // t_blk, Ct // c_blk
    # Keep >=2 parallel grid points so v7x's two TensorCores both get work.
    if (Bl // b_blk) * nT * nC < 2 and b_blk > 1:
        b_blk = _pick_divisor(Bl, 1, max(1, b_blk // 2))
    nB = Bl // b_blk

    kernel = _make_flip_kernel(3, 1, t_blk, vectorized)
    return pl.pallas_call(
        kernel,
        out_shape=jax.ShapeDtypeStruct(x3.shape, x3.dtype),
        grid=(nB, nC, nT),
        in_specs=[pl.BlockSpec((b_blk, t_blk, c_blk),
                               lambda b, c, t: (b, nT - 1 - t, c))],
        out_specs=pl.BlockSpec((b_blk, t_blk, c_blk),
                               lambda b, c, t: (b, t, c)),
        compiler_params=pltpu.CompilerParams(
            dimension_semantics=("parallel", "parallel", "parallel"),
            vmem_limit_bytes=_VMEM_LIMIT_BYTES),
        cost_estimate=pl.CostEstimate(flops=0, transcendentals=0,
                                      bytes_accessed=2 * x3.size * isz),
    )(x3)


def _flip_pallas_2d(x2: jnp.ndarray, vectorized: bool) -> jnp.ndarray:
    """Flip the last (lane) axis of a 2-D (B, T) array in one pass."""
    Bl, T = x2.shape
    isz = jnp.dtype(x2.dtype).itemsize
    s = _sublane_step(isz)

    max_t = max(1, _MAX_BLOCK_BYTES // (s * isz)) if vectorized else 128
    t_blk = _pick_divisor(T, 128, max_t)
    max_b = max(1, _MAX_BLOCK_BYTES // (t_blk * isz))
    b_blk = _pick_divisor(Bl, s, max_b)

    nT = T // t_blk
    if (Bl // b_blk) * nT < 2 and b_blk > 1:
        b_blk = _pick_divisor(Bl, s, max(1, b_blk // 2))
    nB = Bl // b_blk

    kernel = _make_flip_kernel(2, 1, t_blk, vectorized)
    return pl.pallas_call(
        kernel,
        out_shape=jax.ShapeDtypeStruct(x2.shape, x2.dtype),
        grid=(nB, nT),
        in_specs=[pl.BlockSpec((b_blk, t_blk), lambda b, t: (b, nT - 1 - t))],
        out_specs=pl.BlockSpec((b_blk, t_blk), lambda b, t: (b, t)),
        compiler_params=pltpu.CompilerParams(
            dimension_semantics=("parallel", "parallel"),
            vmem_limit_bytes=_VMEM_LIMIT_BYTES),
        cost_estimate=pl.CostEstimate(flops=0, transcendentals=0,
                                      bytes_accessed=2 * x2.size * isz),
    )(x2)


def _flip_axis_pallas(x: jnp.ndarray, axis: int) -> jnp.ndarray:
    """Reverse x along `axis` with a single HBM pass, in the original layout."""
    ndim = x.ndim
    axis = axis % ndim
    T = x.shape[axis]
    if T <= 1 or x.size == 0:
        return x
    lead = math.prod(x.shape[:axis])
    trail = math.prod(x.shape[axis + 1:])
    if axis == ndim - 1:
        y = _flip_pallas_2d(x.reshape(lead, T), _in_kernel_flip_supported("lane"))
    else:
        y = _flip_pallas_3d(x.reshape(lead, T, trail),
                            _in_kernel_flip_supported("sublane"))
    return y.reshape(x.shape)


# ---------------------------------------------------------------------------- module

class Permutation:
    """Flip permutation along a chosen axis (default: sequence axis, dim=1).

    The PyTorch base class is abstract ("Overload me"); this implements the
    canonical flip-permutation subclass used by the GS-Jacobi / TarFlow flows.
    """

    def __init__(self, seq_length: int):
        self.seq_length = seq_length

    def __call__(self, x: jnp.ndarray, dim: int = 1, inverse: bool = False) -> jnp.ndarray:
        # TODO(synk): a non-involutive Permutation subclass (random/learned order)
        # would have to honour `inverse`; the flip permutation is its own inverse.
        del inverse
        dim = dim % x.ndim
        assert x.shape[dim] == self.seq_length, (
            f"expected seq_length={self.seq_length} along dim={dim}, got {x.shape[dim]}")
        return _flip_axis_pallas(x, dim)


if __name__ == "__main__":
    key = jax.random.PRNGKey(0)
    B, T, C = 2, 8, 32                       # batch=2, seq=8, hidden=32
    x = jax.random.normal(key, (B, T, C), dtype=jnp.float32)

    perm_mod = Permutation(seq_length=T)

    # Forward flip along the sequence axis.
    y = jax.block_until_ready(perm_mod(x, dim=1, inverse=False))
    assert jnp.array_equal(y, jnp.flip(x, axis=1)), "Pallas flip permutation mismatch"

    # Involution check: applying the (self-inverse) permutation twice recovers x.
    x_back = jax.block_until_ready(perm_mod(y, dim=1, inverse=True))
    assert jnp.array_equal(x_back, x), "inverse permutation mismatch"

    # Last-axis (lane) flip path of the public API.
    perm_lane = Permutation(seq_length=C)
    z = jax.block_until_ready(perm_lane(x, dim=-1))
    assert jnp.array_equal(z, jnp.flip(x, axis=-1)), "lane-axis flip mismatch"

    print("KERNEL_OK")
</pallas_src>

<mosaic_0001>
module attributes {stable_mosaic.version = 11 : i64} {
  func.func @kernel(%arg0: i32, %arg1: i32, %arg2: i32, %arg3: memref<1x8x32xf32, #tpu.memory_space<vmem>>, %arg4: memref<1x8x32xf32, #tpu.memory_space<vmem>>) attributes {dimension_semantics = [#tpu.dimension_semantics<parallel>, #tpu.dimension_semantics<parallel>, #tpu.dimension_semantics<parallel>], iteration_bounds = array<i64: 2, 1, 1>, scalar_prefetch = 0 : i64, scratch_operands = 0 : i64, tpu.core_type = #tpu.core_type<tc>, window_params = [{transform_indices = @transform_0, window_bounds = array<i64: 1, 8, 32>}, {transform_indices = @transform_1, window_bounds = array<i64: 1, 8, 32>}]} {
    %c0 = arith.constant 0 : index
    %c7 = arith.constant 7 : index
    %c0_0 = arith.constant 0 : index
    %0 = vector.load %arg3[%c0, %c7, %c0_0] : memref<1x8x32xf32, #tpu.memory_space<vmem>>, vector<1x1x32xf32>
    %c0_1 = arith.constant 0 : index
    %c0_2 = arith.constant 0 : index
    %c0_3 = arith.constant 0 : index
    %1 = vector.load %arg4[%c0_1, %c0_2, %c0_3] : memref<1x8x32xf32, #tpu.memory_space<vmem>>, vector<1x1x32xf32>
    tpu.vector_store %arg4[%c0_1, %c0_2, %c0_3], %0 {strides = array<i32>} : memref<1x8x32xf32, #tpu.memory_space<vmem>>, vector<1x1x32xf32>,
    %c0_4 = arith.constant 0 : index
    %c6 = arith.constant 6 : index
    %c0_5 = arith.constant 0 : index
    %2 = vector.load %arg3[%c0_4, %c6, %c0_5] : memref<1x8x32xf32, #tpu.memory_space<vmem>>, vector<1x1x32xf32>
    %c0_6 = arith.constant 0 : index
    %c1 = arith.constant 1 : index
    %c0_7 = arith.constant 0 : index
    %3 = vector.load %arg4[%c0_6, %c1, %c0_7] : memref<1x8x32xf32, #tpu.memory_space<vmem>>, vector<1x1x32xf32>
    tpu.vector_store %arg4[%c0_6, %c1, %c0_7], %2 {strides = array<i32>} : memref<1x8x32xf32, #tpu.memory_space<vmem>>, vector<1x1x32xf32>,
    %c0_8 = arith.constant 0 : index
    %c5 = arith.constant 5 : index
    %c0_9 = arith.constant 0 : index
    %4 = vector.load %arg3[%c0_8, %c5, %c0_9] : memref<1x8x32xf32, #tpu.memory_space<vmem>>, vector<1x1x32xf32>
    %c0_10 = arith.constant 0 : index
    %c2 = arith.constant 2 : index
    %c0_11 = arith.constant 0 : index
    %5 = vector.load %arg4[%c0_10, %c2, %c0_11] : memref<1x8x32xf32, #tpu.memory_space<vmem>>, vector<1x1x32xf32>
    tpu.vector_store %arg4[%c0_10, %c2, %c0_11], %4 {strides = array<i32>} : memref<1x8x32xf32, #tpu.memory_space<vmem>>, vector<1x1x32xf32>,
    %c0_12 = arith.constant 0 : index
    %c4 = arith.constant 4 : index
    %c0_13 = arith.constant 0 : index
    %6 = vector.load %arg3[%c0_12, %c4, %c0_13] : memref<1x8x32xf32, #tpu.memory_space<vmem>>, vector<1x1x32xf32>
    %c0_14 = arith.constant 0 : index
    %c3 = arith.constant 3 : index
    %c0_15 = arith.constant 0 : index
    %7 = vector.load %arg4[%c0_14, %c3, %c0_15] : memref<1x8x32xf32, #tpu.memory_space<vmem>>, vector<1x1x32xf32>
    tpu.vector_store %arg4[%c0_14, %c3, %c0_15], %6 {strides = array<i32>} : memref<1x8x32xf32, #tpu.memory_space<vmem>>, vector<1x1x32xf32>,
    %c0_16 = arith.constant 0 : index
    %c3_17 = arith.constant 3 : index
    %c0_18 = arith.constant 0 : index
    %8 = vector.load %arg3[%c0_16, %c3_17, %c0_18] : memref<1x8x32xf32, #tpu.memory_space<vmem>>, vector<1x1x32xf32>
    %c0_19 = arith.constant 0 : index
    %c4_20 = arith.constant 4 : index
    %c0_21 = arith.constant 0 : index
    %9 = vector.load %arg4[%c0_19, %c4_20, %c0_21] : memref<1x8x32xf32, #tpu.memory_space<vmem>>, vector<1x1x32xf32>
    tpu.vector_store %arg4[%c0_19, %c4_20, %c0_21], %8 {strides = array<i32>} : memref<1x8x32xf32, #tpu.memory_space<vmem>>, vector<1x1x32xf32>,
    %c0_22 = arith.constant 0 : index
    %c2_23 = arith.constant 2 : index
    %c0_24 = arith.constant 0 : index
    %10 = vector.load %arg3[%c0_22, %c2_23, %c0_24] : memref<1x8x32xf32, #tpu.memory_space<vmem>>, vector<1x1x32xf32>
    %c0_25 = arith.constant 0 : index
    %c5_26 = arith.constant 5 : index
    %c0_27 = arith.constant 0 : index
    %11 = vector.load %arg4[%c0_25, %c5_26, %c0_27] : memref<1x8x32xf32, #tpu.memory_space<vmem>>, vector<1x1x32xf32>
    tpu.vector_store %arg4[%c0_25, %c5_26, %c0_27], %10 {strides = array<i32>} : memref<1x8x32xf32, #tpu.memory_space<vmem>>, vector<1x1x32xf32>,
    %c0_28 = arith.constant 0 : index
    %c1_29 = arith.constant 1 : index
    %c0_30 = arith.constant 0 : index
    %12 = vector.load %arg3[%c0_28, %c1_29, %c0_30] : memref<1x8x32xf32, #tpu.memory_space<vmem>>, vector<1x1x32xf32>
    %c0_31 = arith.constant 0 : index
    %c6_32 = arith.constant 6 : index
    %c0_33 = arith.constant 0 : index
    %13 = vector.load %arg4[%c0_31, %c6_32, %c0_33] : memref<1x8x32xf32, #tpu.memory_space<vmem>>, vector<1x1x32xf32>
    tpu.vector_store %arg4[%c0_31, %c6_32, %c0_33], %12 {strides = array<i32>} : memref<1x8x32xf32, #tpu.memory_space<vmem>>, vector<1x1x32xf32>,
    %c0_34 = arith.constant 0 : index
    %c0_35 = arith.constant 0 : index
    %c0_36 = arith.constant 0 : index
    %14 = vector.load %arg3[%c0_34, %c0_35, %c0_36] : memref<1x8x32xf32, #tpu.memory_space<vmem>>, vector<1x1x32xf32>
    %c0_37 = arith.constant 0 : index
    %c7_38 = arith.constant 7 : index
    %c0_39 = arith.constant 0 : index
    %15 = vector.load %arg4[%c0_37, %c7_38, %c0_39] : memref<1x8x32xf32, #tpu.memory_space<vmem>>, vector<1x1x32xf32>
    tpu.vector_store %arg4[%c0_37, %c7_38, %c0_39], %14 {strides = array<i32>} : memref<1x8x32xf32, #tpu.memory_space<vmem>>, vector<1x1x32xf32>,
    return
  }
  func.func @transform_0(%arg0: i32, %arg1: i32, %arg2: i32) -> (i32, i32, i32) {
    %c0_i32 = arith.constant 0 : i32
    %0 = arith.subi %c0_i32, %arg2 : i32
    %c0_i32_0 = arith.constant 0 : i32
    return %arg0, %0, %arg1 : i32, i32, i32
  }
  func.func @transform_1(%arg0: i32, %arg1: i32, %arg2: i32) -> (i32, i32, i32) {
    %c0_i32 = arith.constant 0 : i32
    return %arg0, %arg2, %arg1 : i32, i32, i32
  }
}

</mosaic_0001>

<bundles_post_ra>
// kernel: tpu_custom_call.1
= control target key start
LH: loop header
LB: loop body
LE: loop exit
PB: predicated region body
PF: predicated region fallthrough
CT: control target
= control target key end

     0   :  { %6 = vsyncpa [#allocation3], 0  ;;  %s614_s0 = inlined_call_operand.hbm [shape: f32[2,8,32], index: 0, kind: input, shape index: {}]   ;;  %s615_s1 = inlined_call_operand.hbm [shape: f32[2,8,32], index: 1, kind: output, shape index: {}]  }
   0x1   :  { %8 = vsyncpa [#allocation3 + $0x1], 0 }
   0x2   :  { %9 = vsyncpa [#allocation4], 0 }
   0x3   :  { %11 = vsyncpa [#allocation4 + $0x1], 0  ;;  %s486_s6 = smov 0   ;;  %s488_s7 = smov 0  }
   0x4   :  { %s490_s8 = smov 0   ;;  %s492_s9 = smov 0  }
   0x5   :  { %s494_s10 = smov 0   ;;  %s496_s11 = smov 0  }
   0x6 LB: > { %s287_s12 = sadd.s32 4294967295, %s474_s11   ;;  %s288_s13 = sadd.s32 4294967294, %s474_s11   ;;  %s474_s11 = sphi %s496_s11, %s17_s11   ;;  %s470_s10 = sphi %s494_s10, %s624_s10   ;;  %s466_s9 = sphi %s492_s9, %s623_s9   ;;  %s462_s8 = sphi %s490_s8, %s622_s8   ;;  %s458_s7 = sphi %s488_s7, %s621_s7   ;;  %s454_s6 = sphi %s486_s6, %s620_s6  }
   0x7   : > { %s36_s14 = sadd.s32 1, %s470_s10  ;;  %s49_s15 = sadd.s32 1, %s462_s8 }
   0x8   : > { %p38_p0 = scmp.ge.s32.totalorder %s36_s14, 2  ;;  %p56_p1 = scmp.ne.s32.totalorder %s462_s8, %s458_s7 }
   0x9   : > { %p57_p2 = scmp.eq.s32.totalorder %s474_s11, 0  ;;  %p62_p3 = scmp.ne.s32.totalorder %s458_s7, %s454_s6 }
   0xa   : > { %s626_s14 = smov (%p38_p0, %s36_s14), 0  ;;  %p63_p5 = scmp.eq.s32.totalorder %s287_s12, 0 }
   0xb   : > { %p527_p4 = por %p57_p2, %p56_p1  ;;  %s42_s17 = ssub.s32 %s470_s10, %s626_s14 }
   0xc   : > { %p90_p6 = scmp.eq.s32.totalorder %s287_s12, 1  ;;  %p47_p7 = scmp.eq.s32.totalorder %s42_s17, 0 }
   0xd   : > { %p533_p8 = por %p63_p5, %p62_p3  ;;  %p96_p10 = scmp.eq.s32.totalorder %s288_s13, 1 }
   0xe   : > { %p537_p9 = por %p90_p6, %p56_p1  ;;  %p290_p12 = scmp.ge.s32.totalorder %s474_s11, 2 }
   0xf   : > { %s542_s20 = scalar_select %p47_p7, %s462_s8, %s49_s15  }
  0x10   : > { %p544_p11 = por %p96_p10, %p62_p3  ;;  %p312_p13 = scmp.lt.s32.totalorder %s474_s11, 2 }
  0x11   : > { %s116_s22 = sand.u32 1, %s462_s8   ;;  %s292_s24 = sshll.u32 %s470_s10, 3 }
  0x12   : > { %s291_s23 = sshll.u32 %s116_s22, 3  ;;  %s127_s27 = scalar_lea.hbm %s614_s0, %s292_s24 }
  0x13   : > { %s120_s28 = scalar_lea.vmem [#allocation2], %s291_s23  ;;  %s129_s30 = sshll.u32 %s127_s27, 4  ;;  %s130_s30 = int_to_ptr.hbm [resolvable:$true] %s129_s30 }
  0x14   : > { %s131_s29 = sshll.u32 %s120_s28, 4  ;;  %p305_p0 = pnand %p312_p13, %p527_p4  ;;  %s132_s29 = int_to_ptr.vmem [resolvable:$true] %s131_s29 }
  0x15   : > { %p293_p1 = scmp.ge.s32.totalorder %s474_s11, 1  ;;  %p136_p2 = scmp.lt.s32.totalorder %s474_s11, 3 }
  0x16   : > { %s117_s2 = scalar_lea.sflag [#allocation3], %s116_s22 }
  0x17   : > { %307 = dma.hbm_to_vmem [thread:$0]  (!%p305_p0), %s130_s30, 128, %s132_s29, %s117_s2  }
  0x18   : > { %p137_p3 = pnand %p293_p1, %p136_p2 }
  0x19   : > { %s560_s3 = sand.u32 (!%p137_p3), 1, %s458_s7  }
  0x1a   : > { %140 = sbr.rel (%p137_p3) target bundleno = 49 (0x31), region = 24  ;;  %s294_s4 = sshll.u32 (!%p137_p3), %s560_s3, 3 }
  0x1b   : > { %s143_s5 = scalar_lea.sflag (!%p137_p3), [#allocation3], %s560_s3  ;;  %s146_s12 = scalar_lea.vmem (!%p137_p3), [#allocation2], %s294_s4 }
  0x1f   : > { %445 = dma.done.wait (%p533_p8), %s143_s5, 128  }
  0x20   : > { %447 = vsyncadd (%p533_p8), %s143_s5, 4294967168  ;;  %s297_s13 = sshll.u32 %s466_s9, 3  ;;  %vm168_vm0 = vcmask 253952   ;;  %v167_v0 = vld [vmem:[%s146_s12 + $0x7] sm:$0x1]  ;;  %s165_s22 = scalar_lea.vmem [#allocation5], %s294_s4 }
  0x21   : > { %v170_v1 = vld [vmem:[%s146_s12 + $0x6] sm:$0x1]  ;;  %v172_v2 = vld [vmem:[%s146_s12 + $0x5] sm:$0x1]  ;;  %s197_s17 = scalar_lea.hbm %s615_s1, %s297_s13  ;;  %169 = vst.msk [vmem:[%s165_s22] sm:$0x1] %vm168_vm0, %v167_v0 }
  0x22   : > { %v174_v3 = vld [vmem:[%s146_s12 + $0x4] sm:$0x1]  ;;  %171 = vst.msk [vmem:[%s165_s22 + $0x1] sm:$0x1] %vm168_vm0, %v170_v1  ;;  %v176_v4 = vld [vmem:[%s146_s12 + $0x3] sm:$0x1] }
  0x23   : > { %173 = vst.msk [vmem:[%s165_s22 + $0x2] sm:$0x1] %vm168_vm0, %v172_v2  ;;  %v178_v5 = vld [vmem:[%s146_s12 + $0x2] sm:$0x1]  ;;  %s199_s9 = sshll.u32 %s165_s22, 4  ;;  %s201_s18 = sshll.u32 %s197_s17, 4  ;;  %s200_s9 = int_to_ptr.vmem [resolvable:$true] %s199_s9  ;;  %s202_s18 = int_to_ptr.hbm [resolvable:$true] %s201_s18 }
  0x24   : > { %175 = vst.msk [vmem:[%s165_s22 + $0x3] sm:$0x1] %vm168_vm0, %v174_v3  ;;  %v180_v6 = vld [vmem:[%s146_s12 + $0x1] sm:$0x1]  ;;  %v182_v7 = vld [vmem:[%s146_s12] sm:$0x1] }
  0x25   : > { %177 = vst.msk [vmem:[%s165_s22 + $0x4] sm:$0x1] %vm168_vm0, %v176_v4  ;;  %s185_s23 = scalar_lea.sflag [#allocation4], %s560_s3  ;;  %s406_s24 = sshra.s32 %s202_s18, 4  ;;  %s407_s24 = int_to_ptr.hbm [resolvable:$true] %s406_s24 }
  0x26   : > { %179 = vst.msk [vmem:[%s165_s22 + $0x5] sm:$0x1] %vm168_vm0, %v178_v5  ;;  %s408_s25 = scalar_lea.hbm %s407_s24, 8  ;;  %s412_s28 = scalar_lea.hbm %s615_s1, 16 }
  0x27   : > { %181 = vst.msk [vmem:[%s165_s22 + $0x6] sm:$0x1] %vm168_vm0, %v180_v6  ;;  %p409_p4 = scmp.ne.s32.totalorder %s407_s24, %s408_s25  ;;  %p413_p7 = scmp.lt.s32.totalorder %s407_s24, %s615_s1 }
  0x28   : > { %183 = vst.msk [vmem:[%s165_s22 + $0x7] sm:$0x1] %vm168_vm0, %v182_v7  ;;  %p414_p8 = scmp.lt.s32.totalorder %s412_s28, %s408_s25 }
  0x29   : > { %p410_p5 = pnand %p409_p4, %p537_p9 }
  0x2a   : > { %p415_p10 = por %p414_p8, %p413_p7 }
  0x2b   : > { %p411_p6 = pneg %p410_p5 }
  0x2d   : > { %p416_p13 = pnand %p415_p10, %p411_p6 }
  0x2f   : > { %419 = shalt.err (!%p416_p13)
}
  0x30   : > { %302 = dma.vmem_to_hbm [thread:$0]  (%p537_p9), %s200_s9, 128, %s202_s18, %s185_s23  }
  0x31 PF: > { %s213_s2 = sand.u32 1, %s454_s6   ;;  %p309_p0 = pnand %p290_p12, %p544_p11 }
  0x32   : > { %s214_s3 = scalar_lea.sflag [#allocation4], %s213_s2 }
  0x33   : > { %p310_p1 = pneg %p309_p0 }
  0x35   : > { %449 = dma.done.wait (%p310_p1), %s214_s3, 128  }
  0x36   : > { %451 = vsyncadd (%p310_p1), %s214_s3, 4294967168  ;;  %s17_s11 = sadd.s32 1, %s474_s11   ;;  %s620_s6 = smov %s458_s7 }
  0x37   : > { %p14_p2 = scmp.ge.s32.totalorder %s17_s11, 4   ;;  %s621_s7 = smov %s462_s8 }
  0x38   : > { %s622_s8 = smov %s542_s20  ;;  %s623_s9 = smov %s470_s10 }
  0x39   : > { %s624_s10 = smov %s626_s14  ;;  %16 = sbr.rel (!%p14_p2) target bundleno = 6 (0x6), region = 69 }
  0x3e   :  { %220 = vsyncpa [#allocation3], 1 }
  0x3f   :  { %222 = vsyncpa [#allocation3 + $0x1], 1 }
  0x40   :  { %223 = vsyncpa [#allocation4], 1 }
  0x41   :  { %225 = vsyncpa [#allocation4 + $0x1], 1 }

</bundles_post_ra>
